<compile_context>
chip_gen: v6e
topology: v6e:2x2x1
jax: 0.10.0
libtpu: 0.0.40
codegen_flags: <defaults>
</compile_context>

<pallas_src>
import jax
import jax.numpy as jnp
from jax.experimental import pallas as pl
from jax.experimental.pallas import tpu as pltpu


def mlp_kernel(x_ref, w1_ref, b1_ref, w2_ref, b2_ref, o_ref):
    # x_ref : (Cin,  TILE_P)   pixels on lanes, channels on sublanes
    # w1_ref: (Chid, Cin)      b1_ref: (Chid, 1)  (f32)
    # w2_ref: (Cout, Chid)     b2_ref: (Cout, 1)  (f32)
    # o_ref : (Cout, TILE_P)
    x = x_ref[...].astype(w1_ref.dtype)             # in-kernel cast (no extra HBM pass)
    h = jnp.dot(w1_ref[...], x, preferred_element_type=jnp.float32)
    h = h + b1_ref[...]
    h = jnp.clip(h, 0.0, 6.0)                       # ReLU6
    # Dropout(p=0.0) is identity in the forward pass -> no-op
    o = jnp.dot(w2_ref[...], h.astype(w2_ref.dtype),
                preferred_element_type=jnp.float32)
    o = o + b2_ref[...]
    o_ref[...] = o.astype(o_ref.dtype)


def _vmem_cap_bytes():
    """Generation-aware usable-VMEM cap with compiler headroom."""
    physical = 64 * 1024 * 1024                      # conservative fallback (v7x per-TC)
    try:
        info = pltpu.get_tpu_info()
        cap = getattr(info, "vmem_capacity_bytes", None)
        if cap:
            physical = int(cap)
    except Exception:
        pass
    # Leave >=16 MiB headroom for compiler scratch; never claim more than 112 MiB.
    return max(min(physical - 16 * 1024 * 1024, 112 * 1024 * 1024),
               32 * 1024 * 1024)


def _vmem_estimate(tile_p, cin, chid, cout, in_isz, w_isz, out_isz):
    return (2 * (cin * in_isz + cout * out_isz) * tile_p   # double-buffered I/O tiles
            + 2 * (chid * cin + cout * chid) * w_isz       # weights (2 pipeline buffers)
            + 2 * (chid + cout) * 128 * 4                  # lane-padded biases
            + chid * tile_p * 4)                           # f32 hidden activation


def _choose_pixel_tile(P, B, cin, chid, cout, io_itemsize, vmem_cap, max_tile):
    """Lane-dense (multiple-of-128) pixel tile that fits the VMEM budget.
    No exact-divisor requirement: the grid uses cdiv and Pallas masks the
    final partial tile."""
    budget = int(0.6 * vmem_cap)

    def fits(tp):
        return _vmem_estimate(tp, cin, chid, cout,
                              io_itemsize, io_itemsize, io_itemsize) <= budget

    if P <= max_tile and fits(P):
        # Full extent is always layout-legal.  With B == 1, split into >= 2
        # lane-dense tiles so both v7x TensorCores get grid steps.
        if B == 1 and P > 128:
            half = -(-P // 2)                        # ceil(P / 2)
            return 128 * (-(-half // 128))           # round up to a lane multiple
        return P

    t = min((max_tile // 128) * 128, 128 * (-(-P // 128)))
    while t > 128 and not fits(t):
        t -= 128
    return max(t, 128)


def mlp_pallas(x_nchw, w1, b1, w2, b2, *, max_tile_pixels=2048,
               compute_dtype=None, out_dtype=None):
    """x_nchw: (B, Cin, H, W)
       w1: (Chid, Cin)  -- Conv2d(ci, ch, 1).weight squeezed;  b1: (Chid,)
       w2: (Cout, Chid) -- Conv2d(ch, co, 1).weight squeezed;  b2: (Cout,)
       compute_dtype: optional MXU dtype (e.g. bf16).  Only the (tiny) weights
         are cast host-side; the activation is cast inside the kernel, so no
         extra HBM pass is spent on a wrapper-side astype.
       out_dtype: optional output dtype (e.g. bf16) to halve writeback bytes."""
    B, Cin, H, W = x_nchw.shape
    Chid = w1.shape[0]
    Cout = w2.shape[0]
    P = H * W
    out_dtype = out_dtype or x_nchw.dtype

    # Free reshape (row-major, trailing dims collapse): pixels land on lanes.
    x = x_nchw.reshape(B, Cin, P)

    if compute_dtype is not None:
        w1 = w1.astype(compute_dtype)
        w2 = w2.astype(compute_dtype)

    # Biases as (C, 1) f32 columns: broadcast over the lane (pixel) axis in-kernel.
    b1_2d = b1.reshape(Chid, 1).astype(jnp.float32)
    b2_2d = b2.reshape(Cout, 1).astype(jnp.float32)

    in_itemsize = jnp.dtype(x.dtype).itemsize
    w_itemsize = jnp.dtype(w1.dtype).itemsize
    out_itemsize = jnp.dtype(out_dtype).itemsize

    vmem_cap = _vmem_cap_bytes()
    tile_p = _choose_pixel_tile(P, B, Cin, Chid, Cout,
                                max(in_itemsize, out_itemsize),
                                vmem_cap, max_tile_pixels)
    n_tiles = pl.cdiv(P, tile_p)
    grid = (B, n_tiles)

    est = _vmem_estimate(tile_p, Cin, Chid, Cout,
                         in_itemsize, w_itemsize, out_itemsize)
    vmem_limit = int(min(max(4 * est, 32 * 1024 * 1024), vmem_cap))

    # Advisory cost for XLA scheduling around this mem-bound custom call.
    flops = 2 * B * P * Chid * (Cin + Cout)
    bytes_accessed = (B * P * (Cin * in_itemsize + Cout * out_itemsize)
                      + (Chid * Cin + Cout * Chid) * w_itemsize
                      + (Chid + Cout) * 4)

    # NOTE: weight/bias specs have constant index maps (no per-step re-DMA).
    # Dropping their second pipeline buffer (pl.Buffered(1)) is only worth it
    # for very large Chid; left default here for robustness.
    out = pl.pallas_call(
        mlp_kernel,
        out_shape=jax.ShapeDtypeStruct((B, Cout, P), out_dtype),
        grid_spec=pltpu.PrefetchScalarGridSpec(
            num_scalar_prefetch=0,
            grid=grid,
            in_specs=[
                pl.BlockSpec((None, Cin, tile_p), lambda b, p: (b, 0, p)),
                pl.BlockSpec((Chid, Cin), lambda b, p: (0, 0)),
                pl.BlockSpec((Chid, 1), lambda b, p: (0, 0)),
                pl.BlockSpec((Cout, Chid), lambda b, p: (0, 0)),
                pl.BlockSpec((Cout, 1), lambda b, p: (0, 0)),
            ],
            out_specs=pl.BlockSpec((None, Cout, tile_p), lambda b, p: (b, 0, p)),
        ),
        compiler_params=pltpu.CompilerParams(
            dimension_semantics=("parallel", "parallel"),
            vmem_limit_bytes=vmem_limit,
        ),
        cost_estimate=pl.CostEstimate(
            flops=int(flops),
            transcendentals=0,
            bytes_accessed=int(bytes_accessed),
        ),
    )(x, w1, b1_2d, w2, b2_2d)

    # Free reshape back to NCHW.
    return out.reshape(B, Cout, H, W)


def mlp_reference(x_nchw, w1, b1, w2, b2):
    # Pure-JAX reference of the same math (1x1 convs as channel contractions).
    h = jnp.einsum("bchw,oc->bohw", x_nchw, w1) + b1[None, :, None, None]
    h = jnp.clip(h, 0.0, 6.0)
    o = jnp.einsum("bchw,oc->bohw", h, w2) + b2[None, :, None, None]
    return o


if __name__ == "__main__":
    key = jax.random.PRNGKey(0)

    # ---- Case 1: module-default shapes (B=2, Cin=4, H=W=16, Chid=32, Cout=4) ----
    B, Cin, H, W = 2, 4, 16, 16
    Chid, Cout = 32, Cin

    keys = jax.random.split(key, 10)
    x = jax.random.normal(keys[0], (B, Cin, H, W), dtype=jnp.float32)
    w1 = jax.random.normal(keys[1], (Chid, Cin), dtype=jnp.float32) * 0.1
    b1 = jax.random.normal(keys[2], (Chid,), dtype=jnp.float32) * 0.1
    w2 = jax.random.normal(keys[3], (Cout, Chid), dtype=jnp.float32) * 0.1
    b2 = jax.random.normal(keys[4], (Cout,), dtype=jnp.float32) * 0.1

    ref = mlp_reference(x, w1, b1, w2, b2)

    # f32 path (strict check).
    out = jax.block_until_ready(mlp_pallas(x, w1, b1, w2, b2))
    assert out.shape == (B, Cout, H, W)
    assert jnp.allclose(out, ref, atol=1e-5, rtol=1e-5)

    # bf16 operands + bf16 output (f32 accumulation) — halves DMA bytes.
    out_bf16 = jax.block_until_ready(
        mlp_pallas(x, w1, b1, w2, b2,
                   compute_dtype=jnp.bfloat16, out_dtype=jnp.bfloat16))
    assert out_bf16.shape == (B, Cout, H, W)
    assert out_bf16.dtype == jnp.bfloat16
    assert jnp.allclose(out_bf16.astype(jnp.float32), ref, atol=6e-2, rtol=6e-2)

    # ---- Case 2: ragged pixel count (P=196) + B=1 -> >=2 masked lane-dense tiles ----
    B2, Cin2, H2, W2 = 1, 8, 14, 14
    Chid2, Cout2 = 16, Cin2
    x2 = jax.random.normal(keys[5], (B2, Cin2, H2, W2), dtype=jnp.float32)
    w1b = jax.random.normal(keys[6], (Chid2, Cin2), dtype=jnp.float32) * 0.1
    b1b = jax.random.normal(keys[7], (Chid2,), dtype=jnp.float32) * 0.1
    w2b = jax.random.normal(keys[8], (Cout2, Chid2), dtype=jnp.float32) * 0.1
    b2b = jax.random.normal(keys[9], (Cout2,), dtype=jnp.float32) * 0.1

    ref2 = mlp_reference(x2, w1b, b1b, w2b, b2b)
    out2 = jax.block_until_ready(mlp_pallas(x2, w1b, b1b, w2b, b2b))
    assert out2.shape == (B2, Cout2, H2, W2)
    assert jnp.allclose(out2, ref2, atol=1e-5, rtol=1e-5)

    print("KERNEL_OK")
</pallas_src>

<mosaic_0001>
module attributes {stable_mosaic.version = 11 : i64} {
  func.func @mlp_kernel(%arg0: i32, %arg1: i32, %arg2: memref<1x4x256xf32, #tpu.memory_space<vmem>>, %arg3: memref<32x4xf32, #tpu.memory_space<vmem>>, %arg4: memref<32x1xf32, #tpu.memory_space<vmem>>, %arg5: memref<4x32xf32, #tpu.memory_space<vmem>>, %arg6: memref<4x1xf32, #tpu.memory_space<vmem>>, %arg7: memref<1x4x256xf32, #tpu.memory_space<vmem>>) attributes {dimension_semantics = [#tpu.dimension_semantics<parallel>, #tpu.dimension_semantics<parallel>], iteration_bounds = array<i64: 2, 1>, scalar_prefetch = 0 : i64, scratch_operands = 0 : i64, tpu.core_type = #tpu.core_type<tc>, window_params = [{transform_indices = @transform_0, window_bounds = array<i64: 1, 4, 256>}, {pipeline_mode = #tpu.pipeline_mode<synchronous>, transform_indices = @transform_1, window_bounds = array<i64: 32, 4>}, {pipeline_mode = #tpu.pipeline_mode<synchronous>, transform_indices = @transform_2, window_bounds = array<i64: 32, 1>}, {pipeline_mode = #tpu.pipeline_mode<synchronous>, transform_indices = @transform_3, window_bounds = array<i64: 4, 32>}, {pipeline_mode = #tpu.pipeline_mode<synchronous>, transform_indices = @transform_4, window_bounds = array<i64: 4, 1>}, {transform_indices = @transform_5, window_bounds = array<i64: 1, 4, 256>}]} {
    %c0 = arith.constant 0 : index
    %c0_0 = arith.constant 0 : index
    %c0_1 = arith.constant 0 : index
    %0 = vector.load %arg2[%c0, %c0_0, %c0_1] : memref<1x4x256xf32, #tpu.memory_space<vmem>>, vector<1x4x256xf32>
    %1 = vector.shape_cast %0 : vector<1x4x256xf32> to vector<4x256xf32>
    %c0_2 = arith.constant 0 : index
    %c0_3 = arith.constant 0 : index
    %2 = vector.load %arg3[%c0_2, %c0_3] : memref<32x4xf32, #tpu.memory_space<vmem>>, vector<32x4xf32>
    %cst = arith.constant dense<0.000000e+00> : vector<32x256xf32>
    %3 = tpu.matmul %2, %1, %cst {dimension_numbers = #tpu.dot_dimension_numbers<[1], [0], [0], [1], [0, 0, 1, 1], [], []>} : vector<32x4xf32>, vector<4x256xf32>, vector<32x256xf32> -> vector<32x256xf32>
    %c0_4 = arith.constant 0 : index
    %c0_5 = arith.constant 0 : index
    %4 = vector.load %arg4[%c0_4, %c0_5] : memref<32x1xf32, #tpu.memory_space<vmem>>, vector<32x1xf32>
    %5 = vector.broadcast %4 : vector<32x1xf32> to vector<32x256xf32>
    %6 = arith.addf %3, %5 : vector<32x256xf32>
    %cst_6 = arith.constant 0.000000e+00 : f32
    %cst_7 = arith.constant 6.000000e+00 : f32
    %7 = vector.broadcast %cst_6 : f32 to vector<32x256xf32>
    %8 = arith.maximumf %7, %6 : vector<32x256xf32>
    %9 = vector.broadcast %cst_7 : f32 to vector<32x256xf32>
    %10 = arith.minimumf %9, %8 : vector<32x256xf32>
    %c0_8 = arith.constant 0 : index
    %c0_9 = arith.constant 0 : index
    %11 = vector.load %arg5[%c0_8, %c0_9] : memref<4x32xf32, #tpu.memory_space<vmem>>, vector<4x32xf32>
    %cst_10 = arith.constant dense<0.000000e+00> : vector<4x256xf32>
    %12 = tpu.matmul %11, %10, %cst_10 {dimension_numbers = #tpu.dot_dimension_numbers<[1], [0], [0], [1], [0, 0, 1, 1], [], []>} : vector<4x32xf32>, vector<32x256xf32>, vector<4x256xf32> -> vector<4x256xf32>
    %c0_11 = arith.constant 0 : index
    %c0_12 = arith.constant 0 : index
    %13 = vector.load %arg6[%c0_11, %c0_12] : memref<4x1xf32, #tpu.memory_space<vmem>>, vector<4x1xf32>
    %14 = vector.broadcast %13 : vector<4x1xf32> to vector<4x256xf32>
    %15 = arith.addf %12, %14 : vector<4x256xf32>
    %c0_13 = arith.constant 0 : index
    %c0_14 = arith.constant 0 : index
    %c0_15 = arith.constant 0 : index
    %16 = vector.load %arg7[%c0_13, %c0_14, %c0_15] : memref<1x4x256xf32, #tpu.memory_space<vmem>>, vector<1x4x256xf32>
    %17 = vector.shape_cast %16 : vector<1x4x256xf32> to vector<4x256xf32>
    %18 = vector.shape_cast %15 : vector<4x256xf32> to vector<1x4x256xf32>
    tpu.vector_store %arg7[%c0_13, %c0_14, %c0_15], %18 {strides = array<i32>} : memref<1x4x256xf32, #tpu.memory_space<vmem>>, vector<1x4x256xf32>,
    return
  }
  func.func @transform_0(%arg0: i32, %arg1: i32) -> (i32, i32, i32) {
    %c0_i32 = arith.constant 0 : i32
    %c0_i32_0 = arith.constant 0 : i32
    return %arg0, %c0_i32, %arg1 : i32, i32, i32
  }
  func.func @transform_1(%arg0: i32, %arg1: i32) -> (i32, i32) {
    %c0_i32 = arith.constant 0 : i32
    %c0_i32_0 = arith.constant 0 : i32
    %c0_i32_1 = arith.constant 0 : i32
    return %c0_i32, %c0_i32_0 : i32, i32
  }
  func.func @transform_2(%arg0: i32, %arg1: i32) -> (i32, i32) {
    %c0_i32 = arith.constant 0 : i32
    %c0_i32_0 = arith.constant 0 : i32
    %c0_i32_1 = arith.constant 0 : i32
    return %c0_i32, %c0_i32_0 : i32, i32
  }
  func.func @transform_3(%arg0: i32, %arg1: i32) -> (i32, i32) {
    %c0_i32 = arith.constant 0 : i32
    %c0_i32_0 = arith.constant 0 : i32
    %c0_i32_1 = arith.constant 0 : i32
    return %c0_i32, %c0_i32_0 : i32, i32
  }
  func.func @transform_4(%arg0: i32, %arg1: i32) -> (i32, i32) {
    %c0_i32 = arith.constant 0 : i32
    %c0_i32_0 = arith.constant 0 : i32
    %c0_i32_1 = arith.constant 0 : i32
    return %c0_i32, %c0_i32_0 : i32, i32
  }
  func.func @transform_5(%arg0: i32, %arg1: i32) -> (i32, i32, i32) {
    %c0_i32 = arith.constant 0 : i32
    %c0_i32_0 = arith.constant 0 : i32
    return %arg0, %c0_i32, %arg1 : i32, i32, i32
  }
}

</mosaic_0001>

<bundles_post_ra>
// kernel: tpu_custom_call.1
= control target key start
LH: loop header
LB: loop body
LE: loop exit
PB: predicated region body
PF: predicated region fallthrough
CT: control target
= control target key end

     0   :  { %10 = vsyncpa [#allocation3], 0  ;;  %s910_s0 = inlined_call_operand.vmem [shape: f32[2,4,256], index: 0, kind: input, shape index: {}]   ;;  %s911_s1 = inlined_call_operand.vmem [shape: f32[32,4], index: 1, kind: input, shape index: {}]   ;;  %s912_s2 = inlined_call_operand.vmem [shape: f32[32,1], index: 2, kind: input, shape index: {}]   ;;  %s913_s3 = inlined_call_operand.vmem [shape: f32[4,32], index: 3, kind: input, shape index: {}]   ;;  %s914_s4 = inlined_call_operand.vmem [shape: f32[4,1], index: 4, kind: input, shape index: {}]   ;;  %s915_s5 = inlined_call_operand.hbm [shape: f32[2,4,256], index: 5, kind: output, shape index: {}]  }
   0x1   :  { %12 = vsyncpa [#allocation3 + $0x1], 0  ;;  %s781_s18 = smov 0   ;;  %s783_s19 = smov 0  }
   0x2   :  { %s785_s20 = smov 0   ;;  %s787_s21 = smov 0  }
   0x3   :  { %s789_s22 = smov 0   ;;  %s791_s23 = smov 0  }
   0x4 LB: > { %s588_s24 = sadd.s32 4294967295, %s746_s23   ;;  %s589_s25 = sadd.s32 4294967294, %s746_s23   ;;  %s746_s23 = sphi %s791_s23, %s18_s23   ;;  %s742_s22 = sphi %s789_s22, %s922_s22   ;;  %s738_s21 = sphi %s787_s21, %s921_s21   ;;  %s734_s20 = sphi %s785_s20, %s920_s20   ;;  %s730_s19 = sphi %s783_s19, %s919_s19   ;;  %s726_s18 = sphi %s781_s18, %s918_s18  }
   0x5   : > { %s30_s26 = sadd.s32 1, %s742_s22  ;;  %s151_s27 = sadd.s32 1, %s734_s20 }
   0x6   : > { %p32_p0 = scmp.ge.s32.totalorder %s30_s26, 2  ;;  %p161_p1 = scmp.ne.s32.totalorder %s734_s20, %s730_s19 }
   0x7   : > { %p162_p2 = scmp.eq.s32.totalorder %s588_s24, 1  ;;  %p167_p3 = scmp.ne.s32.totalorder %s730_s19, %s726_s18 }
   0x8   : > { %s924_s26 = smov (%p32_p0, %s30_s26), 0  ;;  %p168_p5 = scmp.eq.s32.totalorder %s589_s25, 1 }
   0x9   : > { %p821_p4 = por %p162_p2, %p161_p1  ;;  %s146_s29 = ssub.s32 %s742_s22, %s924_s26 }
   0xa   : > { %p592_p6 = scmp.ge.s32.totalorder %s746_s23, 1  ;;  %p149_p7 = scmp.eq.s32.totalorder %s146_s29, 0 }
   0xb   : > { %p828_p8 = por %p168_p5, %p167_p3  ;;  %p211_p9 = scmp.lt.s32.totalorder %s746_s23, 3 }
   0xc   : > { %s834_s6 = scalar_select %p149_p7, %s734_s20, %s151_s27  }
   0xd   : > { %p212_p10 = pnand %p592_p6, %p211_p9 }
   0xe   : > { %p244_p11 = scmp.lt.s32.totalorder (!%p212_p10), %s738_s21, 1  ;;  %s240_s17 = sand.u32 (!%p212_p10), 1, %s730_s19  }
   0xf   : > { %215 = sbr.rel (%p212_p10) target bundleno = 463 (0x1cf), region = 40  ;;  %s593_s24 = sshll.u32 (!%p212_p10), %s240_s17, 3 }
  0x10   : > { %s242_s27 = scalar_lea.vmem (!%p212_p10), [#allocation2], %s593_s24  ;;  %s496_s10 = scalar_lea.sflag (!%p212_p10), [#allocation3], %s240_s17 }
  0x11   : > { %s512_s29 = sshll.u32 (!%p212_p10), %s242_s27, 4  ;;  %s513_s29 = int_to_ptr.vmem [resolvable:$true] %s512_s29 }
  0x12   : > { %s670_s11 = scalar_lea.vmem (!%p212_p10), %s513_s29, 128 }
  0x13   : > { %p671_p12 = scmp.ne.s32.totalorder (!%p212_p10), %s513_s29, %s670_s11 }
  0x14   : > { %v748_v0 = vmov 0.0   ;;  %v260_v1 = vld [vmem:[%s912_s2 + $0x8] sm:$0xff]  ;;  %s245_s9 = scalar_select %p244_p11, %s738_s21, 1  ;;  %v749_v2 = vmov 0   ;;  %v262_v3 = vld [vmem:[%s912_s2 + $0x18] sm:$0xff]  ;;  %v259_v4 = vld [vmem:[%s912_s2] sm:$0xff] }
  0x15   : > { %367 = vmatprep.mubr.f32.mxu0 %v748_v0  ;;  %483 = vmatprep.mubr.f32.mxu1 %v748_v0  ;;  %v261_v5 = vld [vmem:[%s912_s2 + $0x10] sm:$0xff]  ;;  %vm298_vm0 = vcmask 1043456   ;;  %v255_v8 = vld [vmem:[%s911_s1] sm:$0xff]  ;;  %vm285_vm1 = vcmask 31744   ;;  %v256_v10 = vld [vmem:[%s911_s1 + $0x8] sm:$0xff]  ;;  %vm415_vm2 = vcmask 261120   ;;  %p672_p13 = pnand %p671_p12, %p821_p4 }
  0x16   : > { %668 = vset.pattern.permute.xlu1 %v749_v2  ;;  %667 = vset.pattern.permute.xlu0 %v749_v2  ;;  %s608_s12 = sshll.u32 %s245_s9, 3  ;;  %v409_v9 = vld [vmem:[%s914_s4] sm:$0xf]  ;;  %v257_v11 = vld [vmem:[%s911_s1 + $0x10] sm:$0xff]  ;;  %v258_v12 = vld [vmem:[%s911_s1 + $0x18] sm:$0xff] }
  0x17   : > { %270 = vperm.xlu1 %668, %v260_v1   ;;  %280 = vperm.xlu0 %667, %v262_v3   ;;  %s251_s25 = scalar_lea.vmem %s910_s0, %s608_s12  ;;  %v408_v49 = vld [vmem:[%s913_s3] sm:$0xf]  ;;  %p673_p0 = pneg %p672_p13 }
  0x18   : > { %v254_v6 = vld [vmem:[%s251_s25] sm:$0xff]  ;;  %s609_s25 = sshll.u32 %s738_s21, 7  ;;  %s750_s12 = smov [#allocation2]  }
  0x19   : > { %v284_v7 = vcombine.high %v254_v6, %v254_v6  ;;  %s510_s9 = scalar_lea.hbm %s915_s5, %s609_s25  ;;  %s674_s13 = sshll.u32 %s750_s12, 4  ;;  %s675_s13 = int_to_ptr.vmem [resolvable:$false] %s674_s13 }
  0x1a   : > { %s676_s21 = scalar_lea.vmem %s675_s13, 256  ;;  %p677_p1 = scmp.lt.s32.totalorder %s513_s29, %s675_s13 }
  0x1b   : > { %265 = vperm.xlu1 %668, %v259_v4   ;;  %275 = vperm.xlu0 %667, %v261_v5   ;;  %p678_p2 = scmp.lt.s32.totalorder %s676_s21, %s670_s11 }
  0x1c   : > { %596 = vmatprep.subr.msk.mxu0 %vm298_vm0, %v284_v7 }
  0x1d   : > { %597 = vmatpush1.msk.msra.mxu0 %vm298_vm0, %v254_v6  ;;  %p679_p3 = por %p678_p2, %p677_p1 }
  0x1e   : > { %598 = vmatmul.mubr.msk.f32.vlgmr.msra.gmra.mxu0 %vm285_vm1, %v255_v8 }
  0x1f   : > { %412 = vperm.xlu0 %667, %v409_v9   ;;  %373 = vmatprep.mubr.f32.mxu0 %v748_v0  ;;  %p680_p5 = pnand %p679_p3, %p673_p0 }
  0x22   : > { %599 = vmatmul.mubr.msk.f32.gmra.mxu0 %vm285_vm1, %v256_v10 }
  0x23   : > { %379 = vmatprep.mubr.f32.mxu0 %v748_v0 }
  0x26   : > { %600 = vmatmul.mubr.msk.f32.gmra.mxu0 %vm285_vm1, %v257_v11 }
  0x27   : > { %385 = vmatprep.mubr.f32.mxu0 %v748_v0 }
  0x2a   : > { %601 = vmatmul.mubr.msk.f32.gmra.mxu0 %vm285_vm1, %v258_v12 }
  0x92   : > { %v281_v16 = vpop.permute.xlu0 %280  ;;  %v271_v19 = vpop.permute.xlu1 %270 }
  0x96   : > { %v276_v21 = vpop.permute.xlu0 %275  ;;  %v266_v27 = vpop.permute.xlu1 %265 }
  0x9a   : > { %v413_v51 = vpop.permute.xlu0 %412 }
  0xde   : > { %v369_v13 = vpop.f32.mrf.mxu0 }
  0xdf   : > { %v370_v35 = vadd.f32 %v369_v13, %v266_v27 }
  0xe0   : > { %v371_v14 = vpop.f32.mrf.mxu0 }
  0xe1   : > { %v372_v32 = vadd.f32 %v371_v14, %v266_v27  ;;  %v392_v43 = vmax.f32 %v370_v35, 0.0 }
  0xe2   : > { %v375_v15 = vpop.f32.mrf.mxu0 }
  0xe3   : > { %v376_v30 = vadd.f32 %v375_v15, %v271_v19  ;;  %v393_v41 = vmax.f32 %v372_v32, 0.0  ;;  %v400_v48 = vmin.f32 %v392_v43, 6.0 }
  0xe4   : > { %v377_v17 = vpop.f32.mrf.mxu0 }
  0xe5   : > { %v378_v28 = vadd.f32 %v377_v17, %v271_v19  ;;  %v394_v39 = vmax.f32 %v376_v30, 0.0  ;;  %v401_v47 = vmin.f32 %v393_v41, 6.0 }
  0xe6   : > { %v381_v18 = vpop.f32.mrf.mxu0 }
  0xe7   : > { %v382_v25 = vadd.f32 %v381_v18, %v276_v21  ;;  %v395_v37 = vmax.f32 %v378_v28, 0.0  ;;  %v402_v46 = vmin.f32 %v394_v39, 6.0 }
  0xe8   : > { %v383_v20 = vpop.f32.mrf.mxu0 }
  0xe9   : > { %v384_v23 = vadd.f32 %v383_v20, %v276_v21  ;;  %v396_v36 = vmax.f32 %v382_v25, 0.0  ;;  %v403_v45 = vmin.f32 %v395_v37, 6.0 }
  0xea   : > { %v387_v22 = vpop.f32.mrf.mxu0 }
  0xeb   : > { %v388_v24 = vadd.f32 %v387_v22, %v281_v16  ;;  %v397_v33 = vmax.f32 %v384_v23, 0.0  ;;  %v404_v44 = vmin.f32 %v396_v36, 6.0 }
  0xec   : > { %v389_v26 = vpop.f32.mrf.mxu0 }
  0xed   : > { %v390_v29 = vadd.f32 %v389_v26, %v281_v16  ;;  %v398_v31 = vmax.f32 %v388_v24, 0.0  ;;  %v405_v42 = vmin.f32 %v397_v33, 6.0 }
  0xef   : > { %v399_v34 = vmax.f32 %v390_v29, 0.0  ;;  %v406_v40 = vmin.f32 %v398_v31, 6.0 }
  0xf1   : > { %v407_v38 = vmin.f32 %v399_v34, 6.0 }
  0xf3   : > { %443 = vmatprep.subr.mxu1 %v407_v38 }
  0xf4   : > { %444 = vmatpush1.msra.mxu1 %v406_v40 }
  0xf5   : > { %445 = vmatprep.subr.mxu1 %v405_v42 }
  0xf6   : > { %446 = vmatpush1.msra.mxu1 %v404_v44 }
  0xf7   : > { %447 = vmatprep.subr.mxu1 %v403_v45 }
  0xf8   : > { %448 = vmatpush1.msra.mxu1 %v402_v46 }
  0xf9   : > { %449 = vmatprep.subr.mxu1 %v401_v47 }
  0xfa   : > { %450 = vmatpush1.msra.mxu1 %v400_v48 }
  0xfb   : > { %602 = vmatmul.mubr.msk.f32.vlgmr.msra.gmra.mxu1 %vm415_vm2, %v408_v49 }
 0x1bb   : > { %v485_v50 = vpop.f32.mrf.mxu1 }
 0x1bc   : > { %v486_v53 = vadd.f32 %v485_v50, %v413_v51 }
 0x1bd   : > { %v487_v52 = vpop.f32.mrf.mxu1 }
 0x1be   : > { %v488_v54 = vadd.f32 %v487_v52, %v413_v51 }
 0x1c0   : > { %v492_v55 = vcombine.low %v486_v53, %v488_v54 }
 0x1c2   : > { %494 = vst [vmem:[%s242_s27] sm:$0xff] %v492_v55 }
 0x1c3   : > { %683 = shalt.err (!%p680_p5)
}
 0x1c4   : > { %s684_s14 = scalar_lea.hbm %s510_s9, 128  ;;  %s688_s17 = scalar_lea.hbm %s915_s5, 256 }
 0x1c5   : > { %p685_p6 = scmp.ne.s32.totalorder %s510_s9, %s684_s14  ;;  %p689_p10 = scmp.lt.s32.totalorder %s510_s9, %s915_s5 }
 0x1c6   : > { %p690_p11 = scmp.lt.s32.totalorder %s688_s17, %s684_s14 }
 0x1c7   : > { %p686_p7 = pnand %p685_p6, %p821_p4 }
 0x1c8   : > { %p691_p12 = por %p690_p11, %p689_p10 }
 0x1c9   : > { %p687_p9 = pneg %p686_p7 }
 0x1cb   : > { %p692_p13 = pnand %p691_p12, %p687_p9 }
 0x1cd   : > { %695 = shalt.err (!%p692_p13)
}
 0x1ce   : > { %610 = dma.vmem_to_hbm [thread:$0]  (%p821_p4), %s513_s29, 128, %s510_s9, %s496_s10  }
 0x1cf PF: > { %p616_p0 = scmp.ge.s32.totalorder %s746_s23, 2  ;;  %s524_s27 = sand.u32 1, %s726_s18  }
 0x1d0   : > { %s525_s7 = scalar_lea.sflag [#allocation3], %s524_s27 }
 0x1d1   : > { %p613_p1 = pnand %p616_p0, %p828_p8 }
 0x1d3   : > { %p614_p2 = pneg %p613_p1 }
 0x1d5   : > { %721 = dma.done.wait (%p614_p2), %s525_s7, 128  }
 0x1d6   : > { %723 = vsyncadd (%p614_p2), %s525_s7, 4294967168  ;;  %s18_s23 = sadd.s32 1, %s746_s23   ;;  %s918_s18 = smov %s730_s19 }
 0x1d7   : > { %p15_p3 = scmp.ge.s32.totalorder %s18_s23, 4   ;;  %s919_s19 = smov %s734_s20 }
 0x1d8   : > { %s920_s20 = smov %s834_s6  ;;  %s921_s21 = smov %s742_s22 }
 0x1d9   : > { %s922_s22 = smov %s924_s26  ;;  %17 = sbr.rel (!%p15_p3) target bundleno = 4 (0x4), region = 75 }
 0x1de   :  { %530 = vsyncpa [#allocation3], 1 }
 0x1df   :  { %532 = vsyncpa [#allocation3 + $0x1], 1 }

</bundles_post_ra>
